<compile_context>
chip_gen: v5e
topology: v5e:2x2
jax: 0.10.0
libtpu: 0.0.40
codegen_flags: <defaults>
</compile_context>

<pallas_src>
import jax
import jax.numpy as jnp
from jax import lax
from jax.experimental import pallas as pl
from jax.experimental.pallas import tpu as pltpu


def _round_up(v, m):
    return (v + m - 1) // m * m


def _vmem_limit_bytes(working_bytes):
    # Leave headroom below the chip's physical VMEM (64 MiB on v7x, 128 MiB on
    # v5e/v6e) for Mosaic internal scratch and per-TC buffer duplication.
    cap = 64 << 20
    try:
        info = pltpu.get_tpu_info()
        cap = int(getattr(info, "vmem_capacity_bytes", cap) or cap)
    except Exception:
        pass
    want = max(2 * working_bytes, 32 << 20)
    return int(max(16 << 20, min(want, cap - (8 << 20))))


def _patch_embed_kernel(x_ref, w_ref, b_ref, o_ref):
    # x_ref: (tile_m, K) compute dtype; w_ref: (E, K) compute dtype;
    # b_ref: (1, E) f32; o_ref: (tile_m, E) out dtype.
    # NT matmul (contract K on both operands) -> no weight transpose needed
    # anywhere; f32 accumulation on the MXU.
    acc = lax.dot_general(
        x_ref[...], w_ref[...],
        dimension_numbers=(((1,), (1,)), ((), ())),
        preferred_element_type=jnp.float32)
    o_ref[...] = (acc + b_ref[...]).astype(o_ref.dtype)


def patch_embed_forward(x, weight, bias, patch_size, flatten=True,
                        compute_dtype=jnp.bfloat16, out_dtype=None,
                        tile_m=512):
    """Reproduces PatchEmbed.forward (norm_layer=None -> Identity).

    x:      (B, C, T, H, W)      NCTHW, same as PyTorch
    weight: (E, C, Pt, Ph, Pw)   same as nn.Conv3d.weight
    bias:   (E,)
    Returns (B, num_patches, E) if flatten else (B, E, Gt, Gh, Gw).

    NOTE: operands are computed in `compute_dtype` (default bf16) with f32
    accumulation and f32 bias; vs PyTorch's f32 Conv3d the only difference is
    operand rounding.  Pass compute_dtype=jnp.float32 for bit-closer results,
    out_dtype=jnp.bfloat16 to halve output HBM traffic for a bf16 trunk.
    """
    B, C, T, H, W = x.shape
    Pt, Ph, Pw = patch_size
    assert T % Pt == 0 and H % Ph == 0 and W % Pw == 0
    Gt, Gh, Gw = T // Pt, H // Ph, W // Pw
    E = weight.shape[0]
    M = B * Gt * Gh * Gw
    K = C * Pt * Ph * Pw
    out_dtype = x.dtype if out_dtype is None else out_dtype

    # ---- patchify: one fused XLA cast+transpose pass, written in compute_dtype
    xp = x.astype(compute_dtype).reshape(B, C, Gt, Pt, Gh, Ph, Gw, Pw)
    xp = xp.transpose(0, 2, 4, 6, 1, 3, 5, 7).reshape(M, K)

    # (E, K) weight: contiguous reshape + cast only (no transpose pass).
    wm = weight.reshape(E, K).astype(compute_dtype)
    bm = bias.astype(jnp.float32).reshape(1, E)

    # ---- K is the lane dim of both matmul operands: keep it 128-aligned.
    #      (Real Prithvi K = C*Pt*Ph*Pw is already a multiple of 128/256.)
    K_pad = _round_up(K, 128)
    if K_pad != K:
        xp = jnp.pad(xp, ((0, 0), (0, K_pad - K)))
        wm = jnp.pad(wm, ((0, 0), (0, K_pad - K)))

    # ---- M tiling: large 16-aligned tiles; ragged last tile handled by
    #      Pallas' masked stores, so out_shape is exactly (M, E) -> no
    #      post-kernel slice, and small M uses a single tile / single step.
    tile_m = max(16, min(int(tile_m), _round_up(M, 16)))
    tile_m = _round_up(tile_m, 16)
    grid_m = pl.cdiv(M, tile_m)

    cbytes = jnp.dtype(compute_dtype).itemsize
    obytes = jnp.dtype(out_dtype).itemsize
    working = (2 * tile_m * K_pad * cbytes      # x tile, double-buffered
               + 2 * E * K_pad * cbytes         # resident weight (conservative 2x)
               + 2 * tile_m * E * obytes        # out tile, double-buffered
               + 2 * E * 4)                     # bias
    vmem_limit = _vmem_limit_bytes(working)

    cost = pl.CostEstimate(
        flops=2 * M * K_pad * E,
        transcendentals=0,
        bytes_accessed=(M * K_pad * cbytes + E * K_pad * cbytes
                        + M * E * obytes + E * 4))

    out = pl.pallas_call(
        _patch_embed_kernel,
        out_shape=jax.ShapeDtypeStruct((M, E), out_dtype),
        grid_spec=pltpu.PrefetchScalarGridSpec(
            num_scalar_prefetch=0,
            grid=(grid_m,),
            in_specs=[
                # TODO(synk): add pipeline_mode=pl.Buffered(3) here if a profile
                # shows exposed DMA on the x tiles.
                pl.BlockSpec((tile_m, K_pad), lambda i: (i, 0)),
                pl.BlockSpec((E, K_pad), lambda i: (0, 0)),   # VMEM-resident weight
                pl.BlockSpec((1, E), lambda i: (0, 0)),       # VMEM-resident bias
            ],
            out_specs=pl.BlockSpec((tile_m, E), lambda i: (i, 0)),
        ),
        compiler_params=pltpu.CompilerParams(
            dimension_semantics=("parallel",),
            vmem_limit_bytes=vmem_limit,
        ),
        cost_estimate=cost,
    )(xp, wm, bm)

    if flatten:
        # torch: proj(x).flatten(2).transpose(1, 2)  (+ Identity norm)
        return out.reshape(B, Gt * Gh * Gw, E)          # metadata-only reshape
    return out.reshape(B, Gt, Gh, Gw, E).transpose(0, 4, 1, 2, 3)


if __name__ == "__main__":
    # Small but consistent shapes: B=2, in_chans=4, T=2, H=W=16,
    # patch_size=(1,4,4), embed_dim=32 -> num_patches = 2*4*4 = 32.
    B, C, T, H, W = 2, 4, 2, 16, 16
    patch_size = (1, 4, 4)
    E = 32

    key = jax.random.PRNGKey(0)
    kx, kw, kb = jax.random.split(key, 3)
    x = jax.random.normal(kx, (B, C, T, H, W), dtype=jnp.float32)
    weight = 0.02 * jax.random.normal(
        kw, (E, C, patch_size[0], patch_size[1], patch_size[2]),
        dtype=jnp.float32)
    bias = 0.01 * jax.random.normal(kb, (E,), dtype=jnp.float32)

    # Quantize x / weight to bf16-representable f32 so the bf16-operand kernel
    # and the f32 XLA reference see identical data (tight tolerance check).
    xq = x.astype(jnp.bfloat16).astype(jnp.float32)
    wq = weight.astype(jnp.bfloat16).astype(jnp.float32)

    out = patch_embed_forward(xq, wq, bias, patch_size, flatten=True)
    out = jax.block_until_ready(out)

    # Correctness check against a pure-JAX reference (strided conv3d).
    ref = jax.lax.conv_general_dilated(
        xq, wq, window_strides=patch_size, padding="VALID",
        dimension_numbers=("NCDHW", "OIDHW", "NCDHW"))
    ref = ref + bias.reshape(1, E, 1, 1, 1)
    ref = ref.reshape(B, E, -1).transpose(0, 2, 1)

    assert out.shape == (B, 2 * 4 * 4, E)
    assert jnp.allclose(out, ref, atol=1e-3, rtol=1e-3)
    print("KERNEL_OK")
</pallas_src>

<mosaic_0001>
module attributes {stable_mosaic.version = 11 : i64} {
  func.func @_patch_embed_kernel(%arg0: i32, %arg1: memref<64x128xbf16, #tpu.memory_space<vmem>>, %arg2: memref<32x128xbf16, #tpu.memory_space<vmem>>, %arg3: memref<1x32xf32, #tpu.memory_space<vmem>>, %arg4: memref<64x32xf32, #tpu.memory_space<vmem>>) attributes {dimension_semantics = [#tpu.dimension_semantics<parallel>], iteration_bounds = array<i64: 1>, scalar_prefetch = 0 : i64, scratch_operands = 0 : i64, tpu.core_type = #tpu.core_type<tc>, window_params = [{transform_indices = @transform_0, window_bounds = array<i64: 64, 128>}, {pipeline_mode = #tpu.pipeline_mode<synchronous>, transform_indices = @transform_1, window_bounds = array<i64: 32, 128>}, {pipeline_mode = #tpu.pipeline_mode<synchronous>, transform_indices = @transform_2, window_bounds = array<i64: 1, 32>}, {transform_indices = @transform_3, window_bounds = array<i64: 64, 32>}]} {
    %c0 = arith.constant 0 : index
    %c0_0 = arith.constant 0 : index
    %0 = vector.load %arg1[%c0, %c0_0] : memref<64x128xbf16, #tpu.memory_space<vmem>>, vector<64x128xbf16>
    %c0_1 = arith.constant 0 : index
    %c0_2 = arith.constant 0 : index
    %1 = vector.load %arg2[%c0_1, %c0_2] : memref<32x128xbf16, #tpu.memory_space<vmem>>, vector<32x128xbf16>
    %cst = arith.constant dense<0.000000e+00> : vector<64x32xf32>
    %2 = tpu.matmul %0, %1, %cst {dimension_numbers = #tpu.dot_dimension_numbers<[1], [1], [0], [0], [0, 0, 1, 0], [], []>} : vector<64x128xbf16>, vector<32x128xbf16>, vector<64x32xf32> -> vector<64x32xf32>
    %c0_3 = arith.constant 0 : index
    %c0_4 = arith.constant 0 : index
    %3 = vector.load %arg3[%c0_3, %c0_4] : memref<1x32xf32, #tpu.memory_space<vmem>>, vector<1x32xf32>
    %4 = vector.broadcast %3 : vector<1x32xf32> to vector<64x32xf32>
    %5 = arith.addf %2, %4 : vector<64x32xf32>
    %c0_5 = arith.constant 0 : index
    %c0_6 = arith.constant 0 : index
    %6 = vector.load %arg4[%c0_5, %c0_6] : memref<64x32xf32, #tpu.memory_space<vmem>>, vector<64x32xf32>
    tpu.vector_store %arg4[%c0_5, %c0_6], %5 {strides = array<i32>} : memref<64x32xf32, #tpu.memory_space<vmem>>, vector<64x32xf32>,
    return
  }
  func.func @transform_0(%arg0: i32) -> (i32, i32) {
    %c0_i32 = arith.constant 0 : i32
    %c0_i32_0 = arith.constant 0 : i32
    return %arg0, %c0_i32 : i32, i32
  }
  func.func @transform_1(%arg0: i32) -> (i32, i32) {
    %c0_i32 = arith.constant 0 : i32
    %c0_i32_0 = arith.constant 0 : i32
    %c0_i32_1 = arith.constant 0 : i32
    return %c0_i32, %c0_i32_0 : i32, i32
  }
  func.func @transform_2(%arg0: i32) -> (i32, i32) {
    %c0_i32 = arith.constant 0 : i32
    %c0_i32_0 = arith.constant 0 : i32
    %c0_i32_1 = arith.constant 0 : i32
    return %c0_i32, %c0_i32_0 : i32, i32
  }
  func.func @transform_3(%arg0: i32) -> (i32, i32) {
    %c0_i32 = arith.constant 0 : i32
    %c0_i32_0 = arith.constant 0 : i32
    return %arg0, %c0_i32 : i32, i32
  }
}

</mosaic_0001>

<bundles_post_ra>
// kernel: tpu_custom_call.1
= control target key start
LH: loop header
LB: loop body
LE: loop exit
PB: predicated region body
PF: predicated region fallthrough
CT: control target
= control target key end

     0   :  { %8 = vsyncpa [#allocation3], 0  ;;  %s301_s0 = inlined_call_operand.hbm [shape: bf16[64,128], index: 0, kind: input, shape index: {}]   ;;  %s302_s1 = inlined_call_operand.hbm [shape: bf16[32,128], index: 1, kind: input, shape index: {}]   ;;  %s303_s2 = inlined_call_operand.vmem [shape: f32[1,32], index: 2, kind: input, shape index: {}]   ;;  %s304_s3 = inlined_call_operand.vmem [shape: f32[64,32], index: 3, kind: output, shape index: {}]  }
   0x1   :  { %s14_s14 = sshll.u32 %s301_s0, 4  ;;  %s15_s14 = int_to_ptr.hbm [resolvable:$true] %s14_s14 }
   0x2   :  { %9 = vsyncpa [#allocation5], 0  ;;  %s236_s15 = smov [#allocation2]   ;;  %s27_s19 = sshll.u32 %s302_s1, 4  ;;  %s28_s19 = int_to_ptr.hbm [resolvable:$true] %s27_s19 }
   0x3   :  { %s16_s16 = sshll.u32 %s236_s15, 4  ;;  %s237_s20 = smov 64   ;;  %s17_s16 = int_to_ptr.vmem [resolvable:$true] %s16_s16 }
   0x4   :  { %s238_s21 = smov 4   ;;  %s239_s22 = smov [#allocation4]  }
   0x5   :  { %22 = dma.hbm_to_vmem [thread:$0]  %s15_s14, 512, %s17_s16, [#allocation3], %s237_s20, %s237_s20, %s238_s21  }
   0x6   :  { %s29_s23 = sshll.u32 %s239_s22, 4  ;;  %s30_s23 = int_to_ptr.vmem [resolvable:$true] %s29_s23 }
   0x7   :  { %35 = dma.hbm_to_vmem [thread:$0]  %s28_s19, 256, %s30_s23, [#allocation5], %s237_s20, %s237_s20, %s238_s21  }
   0x8   :  { %232 = dma.done.wait [#allocation3], 512  }
   0x9   :  { %233 = vsyncadd [#allocation3], 4294966784 }
   0xa   :  { %234 = dma.done.wait [#allocation5], 256  }
   0xb   :  { %235 = vsyncadd [#allocation5], 4294967040  ;;  %v172_v0 = vld [vmem:[#allocation4 + $0x8] sm:$0xff]  ;;  %v171_v1 = vld [vmem:[#allocation4] sm:$0xff]  ;;  %vm128_vm0 = vcmask 261120  }
   0xc   :  { %105 = vmatpush.bf16.xpose.msra.mxu0 %v172_v0  ;;  %173 = vmatpush.bf16.xpose.msra.mxu1 %v172_v0  ;;  %v167_v2 = vld [vmem:[#allocation2] sm:$0xff]  ;;  %v168_v3 = vld [vmem:[#allocation2 + $0x8] sm:$0xff]  ;;  %v169_v4 = vld [vmem:[#allocation2 + $0x10] sm:$0xff] }
   0xd   :  { %174 = vmatpush.bf16.xpose.msra.mxu2 %v172_v0  ;;  %175 = vmatpush.bf16.xpose.msra.mxu3 %v172_v0  ;;  %v170_v5 = vld [vmem:[#allocation2 + $0x18] sm:$0xff]  ;;  %v183_v6 = vld [vmem:[%s303_s2] ss:$0 sm:$0xff] }
  0x14   :  { %106 = vmatpush.bf16.xpose.msra.mxu0 %v171_v1  ;;  %176 = vmatpush.bf16.xpose.msra.mxu1 %v171_v1 }
  0x15   :  { %177 = vmatpush.bf16.xpose.msra.mxu2 %v171_v1  ;;  %178 = vmatpush.bf16.xpose.msra.mxu3 %v171_v1 }
  0x1b   :  { %107 = vmatmul.bf16.vlgmr.msra.gmra.mxu0 %v167_v2  ;;  %112 = vmatmul.bf16.vlgmr.msra.gmra.mxu1 %v168_v3 }
  0x1c   :  { %117 = vmatmul.bf16.vlgmr.msra.gmra.mxu2 %v169_v4  ;;  %122 = vmatmul.bf16.vlgmr.msra.gmra.mxu3 %v170_v5 }
  0x98   :  { %v108_v7 = vpop.f32.mrf.mxu0  ;;  %v113_v8 = vpop.f32.mrf.mxu1 }
  0x99   :  { %v109_v9 = vadd.f32 %v183_v6, %v108_v7  ;;  %v114_v10 = vadd.f32 %v183_v6, %v113_v8 }
  0x9b   :  { %129 = vst.msk [vmem:[%s304_s3] sm:$0xff] %vm128_vm0, %v109_v9 }
  0x9c   :  { %131 = vst.msk [vmem:[%s304_s3 + $0x10] sm:$0xff] %vm128_vm0, %v114_v10 }
  0x9f   :  { %v118_v11 = vpop.f32.mrf.mxu2  ;;  %v123_v12 = vpop.f32.mrf.mxu3 }
  0xa0   :  { %v119_v13 = vadd.f32 %v183_v6, %v118_v11  ;;  %v124_v14 = vadd.f32 %v183_v6, %v123_v12  ;;  %v110_v15 = vpop.f32.mrf.mxu0  ;;  %v115_v16 = vpop.f32.mrf.mxu1 }
  0xa1   :  { %v111_v17 = vadd.f32 %v183_v6, %v110_v15  ;;  %v116_v18 = vadd.f32 %v183_v6, %v115_v16 }
  0xa2   :  { %133 = vst.msk [vmem:[%s304_s3 + $0x20] sm:$0xff] %vm128_vm0, %v119_v13 }
  0xa3   :  { %135 = vst.msk [vmem:[%s304_s3 + $0x30] sm:$0xff] %vm128_vm0, %v124_v14 }
  0xa4   :  { %130 = vst.msk [vmem:[%s304_s3 + $0x8] sm:$0xff] %vm128_vm0, %v111_v17 }
  0xa5   :  { %132 = vst.msk [vmem:[%s304_s3 + $0x18] sm:$0xff] %vm128_vm0, %v116_v18 }
  0xa7   :  { %v120_v19 = vpop.f32.mrf.mxu2  ;;  %v125_v20 = vpop.f32.mrf.mxu3 }
  0xa8   :  { %v121_v21 = vadd.f32 %v183_v6, %v120_v19  ;;  %v126_v22 = vadd.f32 %v183_v6, %v125_v20 }
  0xaa   :  { %134 = vst.msk [vmem:[%s304_s3 + $0x28] sm:$0xff] %vm128_vm0, %v121_v21 }
  0xab   :  { %136 = vst.msk [vmem:[%s304_s3 + $0x38] sm:$0xff] %vm128_vm0, %v126_v22 }
  0xac   :  { %141 = vsyncpa [#allocation3], 1 }
  0xad   :  { %142 = vsyncpa [#allocation5], 1 }

</bundles_post_ra>
